<compile_context>
chip_gen: v5e
topology: v5e:2x2
jax: 0.10.0
libtpu: 0.0.40
codegen_flags: <defaults>
</compile_context>

<pallas_src>
import numpy as np

import jax
import jax.numpy as jnp
from jax.experimental import pallas as pl
from jax.experimental.pallas import tpu as pltpu


def _copy_kernel(x_ref, o_ref):
    # Identity copy of one (TR, L) lane-dense tile.
    o_ref[...] = x_ref[...]


def _sublane_count(dtype):
    itemsize = jnp.dtype(dtype).itemsize
    return max(8, 32 // max(1, itemsize))  # 8 for f32, 16 for bf16, 32 for i8


def _tpu_vmem_capacity_bytes():
    # Generation-aware sizing; conservative (v7x) fallback if query fails.
    try:
        return int(pltpu.get_tpu_info().vmem_capacity_bytes)
    except Exception:
        return 64 * 1024 * 1024


def _tile_and_limit_bytes(vmem_capacity):
    if vmem_capacity >= 100 * 1024 * 1024:
        # v5e / v6e: 128 MiB VMEM -> 16 MiB tiles, 4x live = 64 MiB.
        return 16 * 1024 * 1024, 80 * 1024 * 1024
    # v7x: 64 MiB VMEM -> 8 MiB tiles, 4x live = 32 MiB.
    return 8 * 1024 * 1024, 48 * 1024 * 1024


def _choose_lane_layout(total, dtype, target_tile_bytes):
    """Pick a lane-dense 2D view (rows, lane_width) of `total` flat elements.
    Returns None if no clean 128-multiple lane width exists."""
    if total % 128 != 0:
        return None
    itemsize = jnp.dtype(dtype).itemsize
    sublane = _sublane_count(dtype)
    # Cap lane width so a sublane-deep block still fits the tile budget.
    max_lane = max(128, min(total, target_tile_bytes // (sublane * itemsize)))
    best_any = None    # widest valid lane width
    best_deep = None   # widest lane width that still leaves >= sublane rows
    lane = 128
    while lane <= max_lane:
        if total % lane == 0:
            best_any = lane
            if (total // lane) >= sublane:
                best_deep = lane
        lane += 128
    lane_width = best_deep if best_deep is not None else best_any
    if lane_width is None:
        return None
    return total // lane_width, lane_width


def _choose_tile_rows(rows, lane_width, dtype, target_tile_bytes):
    """Row tile: sublane-aligned, preferably an exact divisor of rows, and
    yielding >= 2 grid steps so both v7x TensorCores get work."""
    itemsize = jnp.dtype(dtype).itemsize
    sublane = _sublane_count(dtype)
    if rows < sublane:
        return rows  # full row dim in one block (legal: equals full extent)
    budget_rows = max(sublane,
                      (target_tile_bytes // (lane_width * itemsize)
                       // sublane) * sublane)
    rows_budget = min(rows, budget_rows)
    # If everything fits in one tile, split into (at least) two so the
    # "parallel" grid axis can shard across v7x's two TensorCores.
    if rows_budget >= rows and rows >= 2 * sublane:
        rows_budget = max(sublane, ((rows + 1) // 2 // sublane) * sublane)
    # Prefer the largest sublane-multiple <= rows_budget that divides rows
    # exactly (no masked remainder block / partial DMA).
    cand = (rows_budget // sublane) * sublane
    while cand >= sublane:
        if rows % cand == 0:
            return cand
        cand -= sublane
    # Fallback: sublane-aligned budget; pl.cdiv remainder block is still legal.
    return rows_budget


def unflatten(x, target_shape, *, use_pallas_copy=True,
              min_pallas_bytes=2 * 1024 * 1024, donate=False):
    """Pallas equivalent of UnFlatten.forward.

    x: array of shape (B, ...) with prod(x.shape[1:]) == prod(target_shape)
    returns: array of shape (B, *target_shape), same dtype, same values.

    use_pallas_copy: engage the Pallas identity-copy path (otherwise the
      metadata-only jnp.reshape is used — the true optimum for this op).
    min_pallas_bytes: below this size the reshape fast path is always used
      (pallas_call launch + DMA setup dwarfs a tiny copy).
    donate: if True, alias the output onto the input HBM buffer
      (input_output_aliases={0: 0}); only do this when the caller actually
      donates x, otherwise XLA inserts a defensive copy.
    """
    b = x.shape[0]
    target_shape = tuple(int(s) for s in target_shape)
    d = int(np.prod(target_shape))
    assert int(np.prod(x.shape[1:])) == d, (
        f"cannot reshape {x.shape} to (B, {target_shape})")
    out_shape = (b,) + target_shape

    itemsize = jnp.dtype(x.dtype).itemsize
    total = b * d
    total_bytes = total * itemsize

    # torch.reshape is metadata-only; this is the optimal path on every TPU,
    # and always the right call for small tensors.
    if not use_pallas_copy or total_bytes < min_pallas_bytes:
        return jnp.reshape(x, out_shape)

    target_tile_bytes, vmem_limit = _tile_and_limit_bytes(
        _tpu_vmem_capacity_bytes())

    layout = _choose_lane_layout(total, x.dtype, target_tile_bytes)
    if layout is None:
        # TODO(synk): totals not divisible by 128 would need masked partial
        # stores; use the zero-cost reshape (exact torch semantics) instead.
        return jnp.reshape(x, out_shape)
    rows, lane_width = layout
    tile_rows = _choose_tile_rows(rows, lane_width, x.dtype, target_tile_bytes)

    # Lane-dense 2D view of the flat data (metadata-only for contiguous input).
    x2d = jnp.reshape(x, (rows, lane_width))

    extra_kwargs = {}
    if donate:
        # Safe only because in/out index_maps are identical (disjoint tiles).
        extra_kwargs["input_output_aliases"] = {0: 0}

    grid = (pl.cdiv(rows, tile_rows),)
    out2d = pl.pallas_call(
        _copy_kernel,
        out_shape=jax.ShapeDtypeStruct((rows, lane_width), x.dtype),
        grid_spec=pltpu.PrefetchScalarGridSpec(
            num_scalar_prefetch=0,
            grid=grid,
            in_specs=[pl.BlockSpec((tile_rows, lane_width), lambda i: (i, 0))],
            out_specs=pl.BlockSpec((tile_rows, lane_width), lambda i: (i, 0)),
        ),
        compiler_params=pltpu.CompilerParams(
            dimension_semantics=("parallel",),
            vmem_limit_bytes=vmem_limit,
        ),
        # Pure-bandwidth hint for XLA's scheduler: read + write of every byte.
        cost_estimate=pl.CostEstimate(
            flops=0, transcendentals=0, bytes_accessed=2 * total_bytes),
        **extra_kwargs,
    )(x2d)

    # Final (B, *target_shape) view — pure metadata, row-major, identical to
    # torch.reshape.
    return jnp.reshape(out2d, out_shape)


if __name__ == "__main__":
    key = jax.random.PRNGKey(0)
    b = 2
    target_shape = (4, 16, 16)          # decoder NCHW target: C=4, H=W=16
    d = int(np.prod(target_shape))      # flat feature dim = 1024

    x = jax.random.normal(key, (b, d), dtype=jnp.float32)
    x_np = np.asarray(x)
    y_ref = x_np.reshape((b,) + target_shape)   # torch.reshape semantics

    # Force the Pallas copy path even at this small size (the default
    # threshold would short-circuit to the metadata-only reshape).
    y = unflatten(x, target_shape, min_pallas_bytes=0)
    y = jax.block_until_ready(y)
    assert y.shape == (b,) + target_shape, y.shape
    assert y.dtype == x.dtype
    np.testing.assert_array_equal(np.asarray(y), y_ref)

    # Non-flat input, different target shape; default thresholds -> the
    # metadata-only reshape fast path (the true optimum for UnFlatten).
    x4 = jax.random.normal(jax.random.PRNGKey(1), (b, 4, 16, 16),
                           dtype=jnp.float32)
    x4_np = np.asarray(x4)
    y4 = jax.block_until_ready(unflatten(x4, (16, 64)))
    np.testing.assert_array_equal(np.asarray(y4), x4_np.reshape(b, 16, 64))

    # Exercise the aliased (donate=True) kernel path as well.
    y4b = jax.block_until_ready(
        unflatten(x4, (16, 64), min_pallas_bytes=0, donate=True))
    np.testing.assert_array_equal(np.asarray(y4b), x4_np.reshape(b, 16, 64))

    print("KERNEL_OK")
</pallas_src>

<mosaic_0001>
module attributes {stable_mosaic.version = 11 : i64} {
  func.func @_copy_kernel(%arg0: i32, %arg1: memref<8x256xf32, #tpu.memory_space<vmem>>, %arg2: memref<8x256xf32, #tpu.memory_space<vmem>>) attributes {dimension_semantics = [#tpu.dimension_semantics<parallel>], iteration_bounds = array<i64: 1>, scalar_prefetch = 0 : i64, scratch_operands = 0 : i64, tpu.core_type = #tpu.core_type<tc>, window_params = [{transform_indices = @transform_0, window_bounds = array<i64: 8, 256>}, {transform_indices = @transform_1, window_bounds = array<i64: 8, 256>}]} {
    %c0 = arith.constant 0 : index
    %c0_0 = arith.constant 0 : index
    %0 = vector.load %arg1[%c0, %c0_0] : memref<8x256xf32, #tpu.memory_space<vmem>>, vector<8x256xf32>
    %c0_1 = arith.constant 0 : index
    %c0_2 = arith.constant 0 : index
    %1 = vector.load %arg2[%c0_1, %c0_2] : memref<8x256xf32, #tpu.memory_space<vmem>>, vector<8x256xf32>
    tpu.vector_store %arg2[%c0_1, %c0_2], %0 {strides = array<i32>} : memref<8x256xf32, #tpu.memory_space<vmem>>, vector<8x256xf32>,
    return
  }
  func.func @transform_0(%arg0: i32) -> (i32, i32) {
    %c0_i32 = arith.constant 0 : i32
    %c0_i32_0 = arith.constant 0 : i32
    return %arg0, %c0_i32 : i32, i32
  }
  func.func @transform_1(%arg0: i32) -> (i32, i32) {
    %c0_i32 = arith.constant 0 : i32
    %c0_i32_0 = arith.constant 0 : i32
    return %arg0, %c0_i32 : i32, i32
  }
}

</mosaic_0001>

<bundles_post_ra>
// kernel: tpu_custom_call.1
= control target key start
LH: loop header
LB: loop body
LE: loop exit
PB: predicated region body
PF: predicated region fallthrough
CT: control target
= control target key end

     0   :  { %6 = vsyncpa [#allocation3], 0  ;;  %s116_s0 = inlined_call_operand.hbm [shape: f32[8,256], index: 0, kind: input, shape index: {}]   ;;  %s117_s1 = inlined_call_operand.hbm [shape: f32[8,256], index: 1, kind: output, shape index: {}]  }
   0x1   :  { %7 = vsyncpa [#allocation4], 0  ;;  %s13_s8 = sshll.u32 %s116_s0, 4  ;;  %s98_s9 = smov [#allocation2]   ;;  %s14_s8 = int_to_ptr.hbm [resolvable:$true] %s13_s8 }
   0x2   :  { %s15_s10 = sshll.u32 %s98_s9, 4  ;;  %s16_s10 = int_to_ptr.vmem [resolvable:$true] %s15_s10 }
   0x3   :  { %18 = dma.hbm_to_vmem [thread:$0]  %s14_s8, 256, %s16_s10, [#allocation3]  }
   0x4   :  { %94 = dma.done.wait [#allocation3], 256  }
   0x5   :  { %95 = vsyncadd [#allocation3], 4294967040  ;;  %s99_s11 = smov [#allocation5]   ;;  %s34_s15 = sshll.u32 %s117_s1, 4  ;;  %v23_v0 = vld [vmem:[#allocation2] sm:$0xff]  ;;  %v24_v1 = vld [vmem:[#allocation2 + $0x8] sm:$0xff]  ;;  %s35_s15 = int_to_ptr.hbm [resolvable:$true] %s34_s15 }
   0x6   :  { %s32_s12 = sshll.u32 %s99_s11, 4  ;;  %25 = vst [vmem:[#allocation5] sm:$0xff] %v23_v0  ;;  %s33_s12 = int_to_ptr.vmem [resolvable:$true] %s32_s12 }
   0x7   :  { %26 = vst [vmem:[#allocation5 + $0x8] sm:$0xff] %v24_v1 }
   0x8   :  { %37 = dma.vmem_to_hbm [thread:$0]  %s33_s12, 256, %s35_s15, [#allocation4]  }
   0x9   :  { %96 = dma.done.wait [#allocation4], 256  }
   0xa   :  { %97 = vsyncadd [#allocation4], 4294967040 }
   0xb   :  { %42 = vsyncpa [#allocation3], 1 }
   0xc   :  { %43 = vsyncpa [#allocation4], 1 }

</bundles_post_ra>
